<compile_context>
chip_gen: v5e
topology: v5e:2x2
jax: 0.10.0
libtpu: 0.0.40
codegen_flags: <defaults>
</compile_context>

<pallas_src>
import functools

import jax
import jax.numpy as jnp
from jax.experimental import pallas as pl
from jax.experimental.pallas import tpu as pltpu


def _round_up(x, m):
    return ((x + m - 1) // m) * m


def _pick_block_bytes():
    """Generation-aware per-block byte target.

    Double-buffered input + output = 4x one block of VMEM; keep that well
    inside each generation's default scoped-VMEM budget:
      v5e and older: 16 MiB default scoped  -> 2 MiB blocks (8 MiB total)
      v6e / v7x:     32 MiB default scoped  -> 4 MiB blocks (16 MiB total)
    """
    try:
        kind = jax.devices()[0].device_kind.lower()
    except Exception:
        return 2 << 20
    for old in ("v2", "v3", "v4", "v5"):
        if old in kind:
            return 2 << 20
    return 4 << 20


def _pick_tiles(rows, lanes, row_mult, block_elems):
    """Pick (row_tile, lane_tile) for a (rows, lanes) array.

    Every tile dim is either the full array dim or a multiple of the hardware
    granularity (row_mult sublanes / 128 lanes), so ragged grids are legal and
    handled by Pallas' masked edge tiles.  Budgeting uses the padded VMEM
    footprint round_up(row, row_mult) * round_up(lane, 128).
    """
    lanes_p = _round_up(lanes, 128)
    # Lane (last-dim) tile: prefer full-width rows (contiguous DMA chunks).
    if lanes_p * row_mult <= block_elems:
        lane_tile = lanes
        lane_tile_p = lanes_p
    else:
        lane_tile = min(lanes, max(128, (block_elems // row_mult // 128) * 128))
        lane_tile_p = _round_up(lane_tile, 128)
    # Row (sublane) tile: fill the remaining padded budget.
    budget_rows = max(row_mult, (block_elems // lane_tile_p // row_mult) * row_mult)
    row_tile = rows if budget_rows >= rows else budget_rows
    return row_tile, lane_tile


def _flr_bias_kernel(x_ref, b_ref, o_ref, *, negative_slope, scale):
    # x_ref: (row_tile, lane_tile); b_ref broadcasts against it
    # ((row_tile, 1) column or (1, lane_tile) row, chosen by the wrapper).
    x = x_ref[...] + b_ref[...]
    pos = jnp.asarray(scale, x.dtype)
    neg = jnp.asarray(negative_slope * scale, x.dtype)
    # One select on constants + one multiply per vreg.
    o_ref[...] = x * jnp.where(x >= 0, pos, neg)


def _flr_nobias_kernel(x_ref, o_ref, *, negative_slope, scale):
    x = x_ref[...]
    pos = jnp.asarray(scale, x.dtype)
    neg = jnp.asarray(negative_slope * scale, x.dtype)
    o_ref[...] = x * jnp.where(x >= 0, pos, neg)


def fused_leaky_relu_pallas(x, bias=None, negative_slope=0.2, scale=2.0 ** 0.5):
    """x: (B, C, H, W) NCHW. bias: (C,) or None. Returns same shape/dtype as x."""
    B, C, H, W = x.shape
    HW = H * W
    dtype = x.dtype
    itemsize = jnp.dtype(dtype).itemsize
    row_mult = 16 if itemsize == 2 else (32 if itemsize == 1 else 8)
    block_elems = max(_pick_block_bytes() // itemsize, 8 * 128)

    # Layout selection (free reshapes of a contiguous tensor, no padding):
    #  * HW >= 128: lane axis = HW, row axis = B*C; bias is a per-row column.
    #  * HW <  128: fold channels into the lane axis so DMA chunks stay
    #    lane-dense; bias becomes a lane-periodic row.
    if HW >= 128:
        rows, lanes = B * C, HW
    else:
        rows, lanes = B, C * HW
    x2 = x.reshape(rows, lanes)

    row_tile, lane_tile = _pick_tiles(rows, lanes, row_mult, block_elems)
    grid = (pl.cdiv(rows, row_tile), pl.cdiv(lanes, lane_tile))

    x_spec = pl.BlockSpec((row_tile, lane_tile), lambda i, j: (i, j))
    out_spec = pl.BlockSpec((row_tile, lane_tile), lambda i, j: (i, j))
    out_shape = jax.ShapeDtypeStruct((rows, lanes), dtype)
    compiler_params = pltpu.CompilerParams(
        dimension_semantics=("parallel", "parallel"))

    if bias is None:
        kernel = functools.partial(
            _flr_nobias_kernel, negative_slope=negative_slope, scale=scale)
        in_specs = [x_spec]
        args = (x2,)
    else:
        if HW >= 128:
            # (rows, 1) bias column, replicated across batch (tiny wrapper op).
            # Block index constant along the lane axis -> stays VMEM-resident.
            b2 = jnp.tile(bias.astype(dtype), B).reshape(rows, 1)
            b_spec = pl.BlockSpec((row_tile, 1), lambda i, j: (i, 0))
        else:
            # Lane-periodic (1, C*HW) bias row for tiny feature maps.
            b2 = jnp.repeat(bias.astype(dtype), HW).reshape(1, lanes)
            b_spec = pl.BlockSpec((1, lane_tile), lambda i, j: (0, j))
        kernel = functools.partial(
            _flr_bias_kernel, negative_slope=negative_slope, scale=scale)
        in_specs = [x_spec, b_spec]
        args = (x2, b2)

    out2 = pl.pallas_call(
        kernel,
        out_shape=out_shape,
        grid_spec=pltpu.PrefetchScalarGridSpec(
            num_scalar_prefetch=0,
            grid=grid,
            in_specs=in_specs,
            out_specs=out_spec,
        ),
        compiler_params=compiler_params,
    )(*args)

    return out2.reshape(B, C, H, W)


class FusedLeakyReLU:
    """JAX/Pallas equivalent of the PyTorch FusedLeakyReLU module."""

    def __init__(self, channel, bias=True, negative_slope=0.2, scale=2.0 ** 0.5,
                 key=None):
        if bias:
            # PyTorch init is zeros; use deterministic small random values so
            # the channel-broadcast path is actually exercised in the test.
            if key is None:
                key = jax.random.PRNGKey(0)
            self.bias = 0.1 * jax.random.normal(key, (channel,), dtype=jnp.float32)
        else:
            self.bias = None
        self.negative_slope = negative_slope
        self.scale = scale

    def __call__(self, inputs):
        return fused_leaky_relu_pallas(
            inputs, self.bias, self.negative_slope, self.scale
        )


def _reference(x, bias, negative_slope, scale):
    if bias is not None:
        x = x + bias.reshape(1, -1, 1, 1).astype(x.dtype)
    return jnp.where(x >= 0, x, x * negative_slope) * scale


if __name__ == "__main__":
    key = jax.random.PRNGKey(0)
    kx, kb, kx2 = jax.random.split(key, 3)

    # Primary shape (HW >= 128 -> per-row bias-column layout).
    B, C, H, W = 2, 4, 16, 16
    x = jax.random.normal(kx, (B, C, H, W), dtype=jnp.float32)
    mod = FusedLeakyReLU(C, bias=True, key=kb)
    out = jax.block_until_ready(mod(x))
    ref = _reference(x, mod.bias, mod.negative_slope, mod.scale)
    assert out.shape == x.shape and out.dtype == x.dtype
    assert jnp.allclose(out, ref, atol=1e-5, rtol=1e-5), "mismatch (bias)"

    # No-bias path.
    mod_nb = FusedLeakyReLU(C, bias=False)
    out_nb = jax.block_until_ready(mod_nb(x))
    ref_nb = _reference(x, None, mod_nb.negative_slope, mod_nb.scale)
    assert jnp.allclose(out_nb, ref_nb, atol=1e-5, rtol=1e-5), "mismatch (no bias)"

    # Tiny-spatial bias path (HW < 128 -> lane-periodic bias-row layout).
    x_small = jax.random.normal(kx2, (2, 6, 4, 4), dtype=jnp.float32)
    mod_s = FusedLeakyReLU(6, bias=True, key=kb)
    out_s = jax.block_until_ready(mod_s(x_small))
    ref_s = _reference(x_small, mod_s.bias, mod_s.negative_slope, mod_s.scale)
    assert jnp.allclose(out_s, ref_s, atol=1e-5, rtol=1e-5), "mismatch (tiny HW)"

    print("KERNEL_OK")
</pallas_src>

<mosaic_0001>
module attributes {stable_mosaic.version = 11 : i64} {
  func.func @_flr_bias_kernel(%arg0: i32, %arg1: i32, %arg2: memref<8x256xf32, #tpu.memory_space<vmem>>, %arg3: memref<8x1xf32, #tpu.memory_space<vmem>>, %arg4: memref<8x256xf32, #tpu.memory_space<vmem>>) attributes {dimension_semantics = [#tpu.dimension_semantics<parallel>, #tpu.dimension_semantics<parallel>], iteration_bounds = array<i64: 1, 1>, scalar_prefetch = 0 : i64, scratch_operands = 0 : i64, tpu.core_type = #tpu.core_type<tc>, window_params = [{transform_indices = @transform_0, window_bounds = array<i64: 8, 256>}, {transform_indices = @transform_1, window_bounds = array<i64: 8, 1>}, {transform_indices = @transform_2, window_bounds = array<i64: 8, 256>}]} {
    %c0 = arith.constant 0 : index
    %c0_0 = arith.constant 0 : index
    %0 = vector.load %arg2[%c0, %c0_0] : memref<8x256xf32, #tpu.memory_space<vmem>>, vector<8x256xf32>
    %c0_1 = arith.constant 0 : index
    %c0_2 = arith.constant 0 : index
    %1 = vector.load %arg3[%c0_1, %c0_2] : memref<8x1xf32, #tpu.memory_space<vmem>>, vector<8x1xf32>
    %2 = vector.broadcast %1 : vector<8x1xf32> to vector<8x256xf32>
    %3 = arith.addf %0, %2 : vector<8x256xf32>
    %cst = arith.constant 0.000000e+00 : f32
    %4 = vector.broadcast %cst : f32 to vector<8x256xf32>
    %5 = arith.cmpf oge, %3, %4 : vector<8x256xf32>
    %cst_3 = arith.constant 1.41421354 : f32
    %cst_4 = arith.constant 0.282842726 : f32
    %6 = vector.broadcast %cst_3 : f32 to vector<8x256xf32>
    %7 = vector.broadcast %cst_4 : f32 to vector<8x256xf32>
    %8 = arith.select %5, %6, %7 : vector<8x256xi1>, vector<8x256xf32>
    %9 = arith.mulf %3, %8 : vector<8x256xf32>
    %c0_5 = arith.constant 0 : index
    %c0_6 = arith.constant 0 : index
    %10 = vector.load %arg4[%c0_5, %c0_6] : memref<8x256xf32, #tpu.memory_space<vmem>>, vector<8x256xf32>
    tpu.vector_store %arg4[%c0_5, %c0_6], %9 {strides = array<i32>} : memref<8x256xf32, #tpu.memory_space<vmem>>, vector<8x256xf32>,
    return
  }
  func.func @transform_0(%arg0: i32, %arg1: i32) -> (i32, i32) {
    %c0_i32 = arith.constant 0 : i32
    return %arg0, %arg1 : i32, i32
  }
  func.func @transform_1(%arg0: i32, %arg1: i32) -> (i32, i32) {
    %c0_i32 = arith.constant 0 : i32
    %c0_i32_0 = arith.constant 0 : i32
    return %arg0, %c0_i32 : i32, i32
  }
  func.func @transform_2(%arg0: i32, %arg1: i32) -> (i32, i32) {
    %c0_i32 = arith.constant 0 : i32
    return %arg0, %arg1 : i32, i32
  }
}

</mosaic_0001>

<bundles_post_ra>
// kernel: tpu_custom_call.1
= control target key start
LH: loop header
LB: loop body
LE: loop exit
PB: predicated region body
PF: predicated region fallthrough
CT: control target
= control target key end

     0   :  { %7 = vsyncpa [#allocation3], 0  ;;  %s146_s0 = inlined_call_operand.hbm [shape: f32[8,256], index: 0, kind: input, shape index: {}]   ;;  %s147_s1 = inlined_call_operand.vmem [shape: f32[8,1], index: 1, kind: input, shape index: {}]   ;;  %s148_s2 = inlined_call_operand.hbm [shape: f32[8,256], index: 2, kind: output, shape index: {}]  }
   0x1   :  { %8 = vsyncpa [#allocation4], 0  ;;  %s14_s11 = sshll.u32 %s146_s0, 4  ;;  %s118_s12 = smov [#allocation2]   ;;  %s15_s11 = int_to_ptr.hbm [resolvable:$true] %s14_s11 }
   0x2   :  { %s16_s13 = sshll.u32 %s118_s12, 4  ;;  %s17_s13 = int_to_ptr.vmem [resolvable:$true] %s16_s13 }
   0x3   :  { %19 = dma.hbm_to_vmem [thread:$0]  %s15_s11, 256, %s17_s13, [#allocation3]  }
   0x4   :  { %114 = dma.done.wait [#allocation3], 256  }
   0x5   :  { %115 = vsyncadd [#allocation3], 4294967040  ;;  %v119_v0 = vmov 0   ;;  %v28_v1 = vld [vmem:[%s147_s1] sm:$0xff]  ;;  %v27_v3 = vld [vmem:[#allocation2 + $0x8] sm:$0xff]  ;;  %s120_s0 = smov [#allocation5]  }
   0x6   :  { %65 = vset.pattern.permute.xlu0 %v119_v0  ;;  %v26_v2 = vld [vmem:[#allocation2] sm:$0xff]  ;;  %s49_s16 = sshll.u32 %s120_s0, 4  ;;  %s51_s19 = sshll.u32 %s148_s2, 4  ;;  %v121_v7 = vmov 0.28284273   ;;  %s50_s16 = int_to_ptr.vmem [resolvable:$true] %s49_s16  ;;  %s52_s19 = int_to_ptr.hbm [resolvable:$true] %s51_s19 }
   0x7   :  { %31 = vperm.xlu0 %65, %v28_v1  }
  0x79   :  { %v32_v4 = vpop.permute.xlu0 %31 }
  0x7a   :  { %v34_v5 = vadd.f32 %v32_v4, %v26_v2  ;;  %v35_v6 = vadd.f32 %v32_v4, %v27_v3 }
  0x7c   :  { %vm36_vm0 = vcmp.ge.f32.partialorder %v34_v5, 0.0  ;;  %vm37_vm1 = vcmp.ge.f32.partialorder %v35_v6, 0.0 }
  0x7d   :  { %v38_v8 = vsel %vm36_vm0, 1.4142135, %v121_v7  ;;  %v39_v9 = vsel %vm37_vm1, 1.4142135, %v121_v7 }
  0x7e   :  { %v40_v10 = vmul.f32 %v38_v8, %v34_v5  ;;  %v41_v11 = vmul.f32 %v39_v9, %v35_v6 }
  0x80   :  { %42 = vst [vmem:[#allocation5] sm:$0xff] %v40_v10 }
  0x81   :  { %43 = vst [vmem:[#allocation5 + $0x8] sm:$0xff] %v41_v11 }
  0x82   :  { %54 = dma.vmem_to_hbm [thread:$0]  %s50_s16, 256, %s52_s19, [#allocation4]  }
  0x83   :  { %116 = dma.done.wait [#allocation4], 256  }
  0x84   :  { %117 = vsyncadd [#allocation4], 4294967040 }
  0x85   :  { %59 = vsyncpa [#allocation3], 1 }
  0x86   :  { %60 = vsyncpa [#allocation4], 1 }

</bundles_post_ra>
